<compile_context>
chip_gen: v6e
topology: v6e:2x2x1
jax: 0.10.0
libtpu: 0.0.40
codegen_flags: <defaults>
</compile_context>

<pallas_src>
import functools
from typing import NamedTuple

import jax
import jax.numpy as jnp
from jax.experimental import pallas as pl
from jax.experimental.pallas import tpu as pltpu


def _round_up(x, m):
    return (x + m - 1) // m * m


def _choose_tiles(n):
    """Padded node dim and aggregation tiles; both tiles divide n_p."""
    n_p = _round_up(n, 128)
    if n_p <= 1024:
        tk = n_p
        tm = 512 if n_p % 512 == 0 else n_p
        return n_p, tm, tk
    n_p = _round_up(n, 512)
    tm = 512
    tk = 1024 if n_p % 1024 == 0 else 512
    return n_p, tm, tk


def _i8_to_bf16(a):
    # int8 -> f32 -> bf16: cheap VPU work, kernel is HBM-bound anyway.
    return a.astype(jnp.float32).astype(jnp.bfloat16)


# ----------------------------------------------------------------------------
# Layer 1 (fused): y2 = d_out * (relu(d_in * (A^T @ (d_out*(X@W1))) + b1) @ W2)
#   grid = (row tiles i, neighbor tiles k); k is the reduction (last).
# ----------------------------------------------------------------------------
def _layer1_kernel(a_ref, x_ref, w1_ref, dout_k_ref, din_i_ref, dout_i_ref,
                   b1_ref, w2_ref, y2_ref, acc_ref):
    k = pl.program_id(1)

    @pl.when(k == 0)
    def _():
        acc_ref[...] = jnp.zeros_like(acc_ref)

    # Recompute the projection for this neighbor tile: (tk, f) @ (f, Hp) with
    # f << Hp, so streaming X instead of Y1 slashes the re-read traffic.
    y1 = jnp.dot(x_ref[...], w1_ref[...], preferred_element_type=jnp.float32)
    y1 = (y1 * dout_k_ref[...]).astype(jnp.bfloat16)        # exact f32 d_out
    a = _i8_to_bf16(a_ref[...])
    acc_ref[...] += jnp.dot(a, y1, preferred_element_type=jnp.float32)

    @pl.when(k == pl.num_programs(1) - 1)
    def _():
        h = acc_ref[...] * din_i_ref[...] + b1_ref[...]
        h = jnp.maximum(h, 0.0).astype(jnp.bfloat16)
        # Fused second projection (W2 resident) so h never hits HBM.
        y2 = jnp.dot(h, w2_ref[...], preferred_element_type=jnp.float32)
        y2_ref[...] = (y2 * dout_i_ref[...]).astype(y2_ref.dtype)


def _layer1(at_i8, x_bf16, w1, dout, din, b1, w2, *, tm, tk, h_p, c_p):
    n_p = at_i8.shape[0]
    f = x_bf16.shape[1]
    return pl.pallas_call(
        _layer1_kernel,
        out_shape=jax.ShapeDtypeStruct((n_p, c_p), jnp.bfloat16),
        grid=(n_p // tm, n_p // tk),
        in_specs=[
            pl.BlockSpec((tm, tk), lambda i, k: (i, k)),    # A^T int8 tile
            pl.BlockSpec((tk, f), lambda i, k: (k, 0)),     # X neighbor rows
            pl.BlockSpec((f, h_p), lambda i, k: (0, 0)),    # W1 (resident)
            pl.BlockSpec((tk, 1), lambda i, k: (k, 0)),     # d_out^{-1/2}[k]
            pl.BlockSpec((tm, 1), lambda i, k: (i, 0)),     # d_in^{-1/2}[i]
            pl.BlockSpec((tm, 1), lambda i, k: (i, 0)),     # d_out^{-1/2}[i]
            pl.BlockSpec((1, h_p), lambda i, k: (0, 0)),    # b1 (resident)
            pl.BlockSpec((h_p, c_p), lambda i, k: (0, 0)),  # W2 (resident)
        ],
        out_specs=pl.BlockSpec((tm, c_p), lambda i, k: (i, 0)),  # resident in k
        scratch_shapes=[pltpu.VMEM((tm, h_p), jnp.float32)],
        compiler_params=pltpu.CompilerParams(
            dimension_semantics=("parallel", "arbitrary")),
    )(at_i8, x_bf16, w1, dout, din, dout, b1, w2)


# ----------------------------------------------------------------------------
# Layer 2: out = d_in * (A^T @ y2) + b2
#   Accumulates straight into the resident f32 output block (no scratch).
#   y2 is kept fully VMEM-resident when small enough (no re-reads).
# ----------------------------------------------------------------------------
def _layer2_kernel(a_ref, y_ref, din_i_ref, b2_ref, out_ref, *, tk, y_resident):
    k = pl.program_id(1)

    @pl.when(k == 0)
    def _():
        out_ref[...] = jnp.zeros_like(out_ref)

    a = _i8_to_bf16(a_ref[...])
    if y_resident:
        y = y_ref[pl.ds(pl.multiple_of(k * tk, tk), tk), :]
    else:
        y = y_ref[...]
    out_ref[...] += jnp.dot(a, y, preferred_element_type=jnp.float32)

    @pl.when(k == pl.num_programs(1) - 1)
    def _():
        out_ref[...] = out_ref[...] * din_i_ref[...] + b2_ref[...]


def _layer2(at_i8, y2, din, b2, *, tm, tk, c_p):
    n_p = at_i8.shape[0]
    # Fully-resident y2 removes all re-reads; 4 MiB keeps us well inside even
    # v5e's 16 MiB default scoped VMEM (and v7x's 32 MiB) with double-buffering.
    y_resident = (n_p * c_p * 2) <= 4 * 1024 * 1024
    if y_resident:
        y_spec = pl.BlockSpec((n_p, c_p), lambda i, k: (0, 0))
    else:
        y_spec = pl.BlockSpec((tk, c_p), lambda i, k: (k, 0))
    kernel = functools.partial(_layer2_kernel, tk=tk, y_resident=y_resident)
    return pl.pallas_call(
        kernel,
        out_shape=jax.ShapeDtypeStruct((n_p, c_p), jnp.float32),
        grid=(n_p // tm, n_p // tk),
        in_specs=[
            pl.BlockSpec((tm, tk), lambda i, k: (i, k)),    # A^T int8 tile
            y_spec,                                          # y2
            pl.BlockSpec((tm, 1), lambda i, k: (i, 0)),     # d_in^{-1/2}[i]
            pl.BlockSpec((1, c_p), lambda i, k: (0, 0)),    # b2 (resident)
        ],
        out_specs=pl.BlockSpec((tm, c_p), lambda i, k: (i, 0)),
        compiler_params=pltpu.CompilerParams(
            dimension_semantics=("parallel", "arbitrary")),
    )(at_i8, y2, din, b2)


# ----------------------------------------------------------------------------
# Graph preprocessing (do ONCE per graph; the graph is static across calls)
# ----------------------------------------------------------------------------
class GraphData(NamedTuple):
    at_i8: jax.Array   # (n_p, n_p) int8: zero-padded raw A^T (0/1 values)
    din: jax.Array     # (n_p, 1) f32: in-degree^{-1/2} (clamped to >= 1)
    dout: jax.Array    # (n_p, 1) f32: out-degree^{-1/2} (clamped to >= 1)
    n: int
    n_p: int
    tm: int
    tk: int


def prepare_graph(adj_raw):
    """adj_raw[u, v] = 1 means a directed edge u -> v (messages flow u -> v)."""
    n = adj_raw.shape[0]
    n_p, tm, tk = _choose_tiles(n)
    assert n_p % tm == 0 and n_p % tk == 0, (n_p, tm, tk)
    out_deg = jnp.clip(jnp.sum(adj_raw, axis=1), 1.0, None)
    in_deg = jnp.clip(jnp.sum(adj_raw, axis=0), 1.0, None)
    at_i8 = jnp.zeros((n_p, n_p), jnp.int8).at[:n, :n].set(
        adj_raw.T.astype(jnp.int8))
    din = jnp.zeros((n_p, 1), jnp.float32).at[:n, 0].set(
        in_deg.astype(jnp.float32) ** -0.5)
    dout = jnp.zeros((n_p, 1), jnp.float32).at[:n, 0].set(
        out_deg.astype(jnp.float32) ** -0.5)
    return GraphData(at_i8, din, dout, n, n_p, tm, tk)


# ----------------------------------------------------------------------------
# Forward wrapper
# ----------------------------------------------------------------------------
def gcn_forward(graph: GraphData, x, w1, b1, w2, b2):
    n, f = x.shape
    hidden = w1.shape[1]
    classes = w2.shape[1]
    n_p, tm, tk = graph.n_p, graph.tm, graph.tk
    h_p = _round_up(hidden, 128)   # lane-dense hidden
    c_p = _round_up(classes, 128)  # lane-dense classes

    cdt = jnp.bfloat16
    x_p = jnp.zeros((n_p, f), cdt).at[:n, :].set(x.astype(cdt))
    w1_p = jnp.zeros((f, h_p), cdt).at[:, :hidden].set(w1.astype(cdt))
    b1_p = jnp.zeros((1, h_p), jnp.float32).at[:, :hidden].set(
        jnp.reshape(b1, (1, -1)).astype(jnp.float32))
    w2_p = jnp.zeros((h_p, c_p), cdt).at[:hidden, :classes].set(w2.astype(cdt))
    b2_p = jnp.zeros((1, c_p), jnp.float32).at[:, :classes].set(
        jnp.reshape(b2, (1, -1)).astype(jnp.float32))

    # Layer 1 (fused): y2 = d_out * (relu(d_in*(A^T @ (d_out*(X@W1))) + b1) @ W2)
    y2 = _layer1(graph.at_i8, x_p, w1_p, graph.dout, graph.din, b1_p, w2_p,
                 tm=tm, tk=tk, h_p=h_p, c_p=c_p)
    # Layer 2: out = d_in * (A^T @ y2) + b2
    out = _layer2(graph.at_i8, y2, graph.din, b2_p, tm=tm, tk=tk, c_p=c_p)
    return out[:n, :classes]


if __name__ == "__main__":
    # Small, deterministic problem: N nodes, in_feats, hidden, classes.
    N, IN_FEATS, HIDDEN, NUM_CLASSES = 16, 8, 32, 4

    key = jax.random.PRNGKey(0)
    k_adj, k_x, k_w1, k_b1, k_w2, k_b2 = jax.random.split(key, 6)

    adj_raw = (jax.random.uniform(k_adj, (N, N)) < 0.25).astype(jnp.float32)
    graph = prepare_graph(adj_raw)   # one-time, cached across forward calls

    x = jax.random.normal(k_x, (N, IN_FEATS), dtype=jnp.float32)
    w1 = jax.random.normal(k_w1, (IN_FEATS, HIDDEN), dtype=jnp.float32) * (
        1.0 / IN_FEATS ** 0.5)
    b1 = jax.random.normal(k_b1, (1, HIDDEN), dtype=jnp.float32) * 0.01
    w2 = jax.random.normal(k_w2, (HIDDEN, NUM_CLASSES), dtype=jnp.float32) * (
        1.0 / HIDDEN ** 0.5)
    b2 = jax.random.normal(k_b2, (1, NUM_CLASSES), dtype=jnp.float32) * 0.01

    out = gcn_forward(graph, x, w1, b1, w2, b2)
    out = jax.block_until_ready(out)

    # Pure-JAX reference mirroring the kernel's precision choices (bf16 dense
    # operands, exact f32 degree normalisation, f32 accumulation).
    def bf(v):
        return v.astype(jnp.bfloat16).astype(jnp.float32)

    in_deg = jnp.clip(adj_raw.sum(axis=0), 1.0, None)
    out_deg = jnp.clip(adj_raw.sum(axis=1), 1.0, None)
    din = in_deg ** -0.5
    dout = out_deg ** -0.5
    at = adj_raw.T

    y1_ref = bf((bf(x) @ bf(w1)) * dout[:, None])
    h_ref = jnp.maximum((at @ y1_ref) * din[:, None] + b1, 0.0)
    y2_ref = bf((bf(h_ref) @ bf(w2)) * dout[:, None])
    ref_out = (at @ y2_ref) * din[:, None] + b2

    assert out.shape == (N, NUM_CLASSES)
    assert jnp.allclose(out, ref_out, atol=1e-2, rtol=1e-2), (
        float(jnp.max(jnp.abs(out - ref_out))))

    print("KERNEL_OK")
</pallas_src>

<mosaic_0001>
module attributes {stable_mosaic.version = 11 : i64} {
  func.func @_layer1_kernel(%arg0: i32, %arg1: i32, %arg2: memref<128x128xi8, #tpu.memory_space<vmem>>, %arg3: memref<128x8xbf16, #tpu.memory_space<vmem>>, %arg4: memref<8x128xbf16, #tpu.memory_space<vmem>>, %arg5: memref<128x1xf32, #tpu.memory_space<vmem>>, %arg6: memref<128x1xf32, #tpu.memory_space<vmem>>, %arg7: memref<128x1xf32, #tpu.memory_space<vmem>>, %arg8: memref<1x128xf32, #tpu.memory_space<vmem>>, %arg9: memref<128x128xbf16, #tpu.memory_space<vmem>>, %arg10: memref<128x128xbf16, #tpu.memory_space<vmem>>, %arg11: memref<128x128xf32, #tpu.memory_space<vmem>>) attributes {dimension_semantics = [#tpu.dimension_semantics<parallel>, #tpu.dimension_semantics<arbitrary>], iteration_bounds = array<i64: 1, 1>, scalar_prefetch = 0 : i64, scratch_operands = 1 : i64, tpu.core_type = #tpu.core_type<tc>, window_params = [{transform_indices = @transform_0, window_bounds = array<i64: 128, 128>}, {transform_indices = @transform_1, window_bounds = array<i64: 128, 8>}, {pipeline_mode = #tpu.pipeline_mode<synchronous>, transform_indices = @transform_2, window_bounds = array<i64: 8, 128>}, {transform_indices = @transform_3, window_bounds = array<i64: 128, 1>}, {transform_indices = @transform_4, window_bounds = array<i64: 128, 1>}, {transform_indices = @transform_5, window_bounds = array<i64: 128, 1>}, {pipeline_mode = #tpu.pipeline_mode<synchronous>, transform_indices = @transform_6, window_bounds = array<i64: 1, 128>}, {pipeline_mode = #tpu.pipeline_mode<synchronous>, transform_indices = @transform_7, window_bounds = array<i64: 128, 128>}, {transform_indices = @transform_8, window_bounds = array<i64: 128, 128>}]} {
    %c0_i32 = arith.constant 0 : i32
    %0 = arith.cmpi eq, %arg1, %c0_i32 : i32
    %1 = arith.extui %0 : i1 to i32
    %c0_i32_0 = arith.constant 0 : i32
    %2 = arith.cmpi ne, %1, %c0_i32_0 : i32
    scf.if %2 {
      %cst_15 = arith.constant 0.000000e+00 : f32
      %20 = vector.broadcast %cst_15 : f32 to vector<128x128xf32>
      %c0_16 = arith.constant 0 : index
      %c0_17 = arith.constant 0 : index
      %21 = vector.load %arg11[%c0_16, %c0_17] : memref<128x128xf32, #tpu.memory_space<vmem>>, vector<128x128xf32>
      tpu.vector_store %arg11[%c0_16, %c0_17], %20 {strides = array<i32>} : memref<128x128xf32, #tpu.memory_space<vmem>>, vector<128x128xf32>,
    } else {
    }
    %c0 = arith.constant 0 : index
    %c0_1 = arith.constant 0 : index
    %3 = vector.load %arg3[%c0, %c0_1] : memref<128x8xbf16, #tpu.memory_space<vmem>>, vector<128x8xbf16>
    %c0_2 = arith.constant 0 : index
    %c0_3 = arith.constant 0 : index
    %4 = vector.load %arg4[%c0_2, %c0_3] : memref<8x128xbf16, #tpu.memory_space<vmem>>, vector<8x128xbf16>
    %cst = arith.constant dense<0.000000e+00> : vector<128x128xf32>
    %5 = tpu.matmul %3, %4, %cst {dimension_numbers = #tpu.dot_dimension_numbers<[1], [0], [0], [1], [0, 0, 1, 1], [], []>} : vector<128x8xbf16>, vector<8x128xbf16>, vector<128x128xf32> -> vector<128x128xf32>
    %c0_4 = arith.constant 0 : index
    %c0_5 = arith.constant 0 : index
    %6 = vector.load %arg5[%c0_4, %c0_5] : memref<128x1xf32, #tpu.memory_space<vmem>>, vector<128x1xf32>
    %7 = vector.broadcast %6 : vector<128x1xf32> to vector<128x128xf32>
    %8 = arith.mulf %5, %7 : vector<128x128xf32>
    %9 = arith.truncf %8 : vector<128x128xf32> to vector<128x128xbf16>
    %c0_6 = arith.constant 0 : index
    %c0_7 = arith.constant 0 : index
    %10 = vector.load %arg2[%c0_6, %c0_7] : memref<128x128xi8, #tpu.memory_space<vmem>>, vector<128x128xi8>
    %11 = arith.sitofp %10 : vector<128x128xi8> to vector<128x128xf32>
    %12 = arith.truncf %11 : vector<128x128xf32> to vector<128x128xbf16>
    %c0_8 = arith.constant 0 : index
    %c0_9 = arith.constant 0 : index
    %13 = vector.load %arg11[%c0_8, %c0_9] : memref<128x128xf32, #tpu.memory_space<vmem>>, vector<128x128xf32>
    %cst_10 = arith.constant dense<0.000000e+00> : vector<128x128xf32>
    %14 = tpu.matmul %12, %9, %cst_10 {dimension_numbers = #tpu.dot_dimension_numbers<[1], [0], [0], [1], [0, 0, 1, 1], [], []>} : vector<128x128xbf16>, vector<128x128xbf16>, vector<128x128xf32> -> vector<128x128xf32>
    %15 = arith.addf %13, %14 : vector<128x128xf32>
    %c0_11 = arith.constant 0 : index
    %c0_12 = arith.constant 0 : index
    %16 = vector.load %arg11[%c0_11, %c0_12] : memref<128x128xf32, #tpu.memory_space<vmem>>, vector<128x128xf32>
    tpu.vector_store %arg11[%c0_11, %c0_12], %15 {strides = array<i32>} : memref<128x128xf32, #tpu.memory_space<vmem>>, vector<128x128xf32>,
    %c0_i32_13 = arith.constant 0 : i32
    %17 = arith.cmpi eq, %arg1, %c0_i32_13 : i32
    %18 = arith.extui %17 : i1 to i32
    %c0_i32_14 = arith.constant 0 : i32
    %19 = arith.cmpi ne, %18, %c0_i32_14 : i32
    scf.if %19 {
      %c0_15 = arith.constant 0 : index
      %c0_16 = arith.constant 0 : index
      %20 = vector.load %arg11[%c0_15, %c0_16] : memref<128x128xf32, #tpu.memory_space<vmem>>, vector<128x128xf32>
      %c0_17 = arith.constant 0 : index
      %c0_18 = arith.constant 0 : index
      %21 = vector.load %arg6[%c0_17, %c0_18] : memref<128x1xf32, #tpu.memory_space<vmem>>, vector<128x1xf32>
      %22 = vector.broadcast %21 : vector<128x1xf32> to vector<128x128xf32>
      %23 = arith.mulf %20, %22 : vector<128x128xf32>
      %c0_19 = arith.constant 0 : index
      %c0_20 = arith.constant 0 : index
      %24 = vector.load %arg8[%c0_19, %c0_20] : memref<1x128xf32, #tpu.memory_space<vmem>>, vector<1x128xf32>
      %25 = vector.broadcast %24 : vector<1x128xf32> to vector<128x128xf32>
      %26 = arith.addf %23, %25 : vector<128x128xf32>
      %cst_21 = arith.constant 0.000000e+00 : f32
      %27 = vector.broadcast %cst_21 : f32 to vector<128x128xf32>
      %28 = arith.maximumf %26, %27 : vector<128x128xf32>
      %29 = arith.truncf %28 : vector<128x128xf32> to vector<128x128xbf16>
      %c0_22 = arith.constant 0 : index
      %c0_23 = arith.constant 0 : index
      %30 = vector.load %arg9[%c0_22, %c0_23] : memref<128x128xbf16, #tpu.memory_space<vmem>>, vector<128x128xbf16>
      %cst_24 = arith.constant dense<0.000000e+00> : vector<128x128xf32>
      %31 = tpu.matmul %29, %30, %cst_24 {dimension_numbers = #tpu.dot_dimension_numbers<[1], [0], [0], [1], [0, 0, 1, 1], [], []>} : vector<128x128xbf16>, vector<128x128xbf16>, vector<128x128xf32> -> vector<128x128xf32>
      %c0_25 = arith.constant 0 : index
      %c0_26 = arith.constant 0 : index
      %32 = vector.load %arg7[%c0_25, %c0_26] : memref<128x1xf32, #tpu.memory_space<vmem>>, vector<128x1xf32>
      %33 = vector.broadcast %32 : vector<128x1xf32> to vector<128x128xf32>
      %34 = arith.mulf %31, %33 : vector<128x128xf32>
      %35 = arith.truncf %34 : vector<128x128xf32> to vector<128x128xbf16>
      %c0_27 = arith.constant 0 : index
      %c0_28 = arith.constant 0 : index
      %36 = vector.load %arg10[%c0_27, %c0_28] : memref<128x128xbf16, #tpu.memory_space<vmem>>, vector<128x128xbf16>
      tpu.vector_store %arg10[%c0_27, %c0_28], %35 {strides = array<i32>} : memref<128x128xbf16, #tpu.memory_space<vmem>>, vector<128x128xbf16>,
    } else {
    }
    return
  }
  func.func @transform_0(%arg0: i32, %arg1: i32) -> (i32, i32) {
    %c0_i32 = arith.constant 0 : i32
    return %arg0, %arg1 : i32, i32
  }
  func.func @transform_1(%arg0: i32, %arg1: i32) -> (i32, i32) {
    %c0_i32 = arith.constant 0 : i32
    %c0_i32_0 = arith.constant 0 : i32
    return %arg1, %c0_i32 : i32, i32
  }
  func.func @transform_2(%arg0: i32, %arg1: i32) -> (i32, i32) {
    %c0_i32 = arith.constant 0 : i32
    %c0_i32_0 = arith.constant 0 : i32
    %c0_i32_1 = arith.constant 0 : i32
    return %c0_i32, %c0_i32_0 : i32, i32
  }
  func.func @transform_3(%arg0: i32, %arg1: i32) -> (i32, i32) {
    %c0_i32 = arith.constant 0 : i32
    %c0_i32_0 = arith.constant 0 : i32
    return %arg1, %c0_i32 : i32, i32
  }
  func.func @transform_4(%arg0: i32, %arg1: i32) -> (i32, i32) {
    %c0_i32 = arith.constant 0 : i32
    %c0_i32_0 = arith.constant 0 : i32
    return %arg0, %c0_i32 : i32, i32
  }
  func.func @transform_5(%arg0: i32, %arg1: i32) -> (i32, i32) {
    %c0_i32 = arith.constant 0 : i32
    %c0_i32_0 = arith.constant 0 : i32
    return %arg0, %c0_i32 : i32, i32
  }
  func.func @transform_6(%arg0: i32, %arg1: i32) -> (i32, i32) {
    %c0_i32 = arith.constant 0 : i32
    %c0_i32_0 = arith.constant 0 : i32
    %c0_i32_1 = arith.constant 0 : i32
    return %c0_i32, %c0_i32_0 : i32, i32
  }
  func.func @transform_7(%arg0: i32, %arg1: i32) -> (i32, i32) {
    %c0_i32 = arith.constant 0 : i32
    %c0_i32_0 = arith.constant 0 : i32
    %c0_i32_1 = arith.constant 0 : i32
    return %c0_i32, %c0_i32_0 : i32, i32
  }
  func.func @transform_8(%arg0: i32, %arg1: i32) -> (i32, i32) {
    %c0_i32 = arith.constant 0 : i32
    %c0_i32_0 = arith.constant 0 : i32
    return %arg0, %c0_i32 : i32, i32
  }
}

</mosaic_0001>

<bundles_post_ra>
// kernel: tpu_custom_call.1
= control target key start
LH: loop header
LB: loop body
LE: loop exit
PB: predicated region body
PF: predicated region fallthrough
CT: control target
= control target key end

     0   :  { %vm133_vm0 = vcmask 1043456   ;;  %vm108_vm1 = vcmask 64512   ;;  %v1330_v5 = vmov 0   ;;  %s1625_s0 = inlined_call_operand.vmem [shape: s8[128,128], index: 0, kind: input, shape index: {}]   ;;  %s1626_s1 = inlined_call_operand.vmem [shape: bf16[128,8], index: 1, kind: input, shape index: {}]   ;;  %s1627_s2 = inlined_call_operand.vmem [shape: bf16[8,128], index: 2, kind: input, shape index: {}]   ;;  %s1628_s3 = inlined_call_operand.vmem [shape: f32[128,1], index: 3, kind: input, shape index: {}]   ;;  %s1629_s4 = inlined_call_operand.vmem [shape: f32[128,1], index: 4, kind: input, shape index: {}]   ;;  %s1630_s5 = inlined_call_operand.vmem [shape: f32[128,1], index: 5, kind: input, shape index: {}]   ;;  %s1631_s6 = inlined_call_operand.vmem [shape: f32[1,128], index: 6, kind: input, shape index: {}]   ;;  %s1632_s7 = inlined_call_operand.vmem [shape: bf16[128,128], index: 7, kind: input, shape index: {}]   ;;  %s1633_s8 = inlined_call_operand.hbm [shape: bf16[128,128], index: 8, kind: output, shape index: {}]  }
   0x1   :  { %v67_v0 = vld [vmem:[%s1627_s2] sm:$0xf]  ;;  %v1293_v3 = vld [vmem:[%s1626_s1 + $0x8] sm:$0xff]   ;;  %v248_v4 = vld [vmem:[%s1628_s3 + $0x70] sm:$0xff]  ;;  %1290 = vset.pattern.permute.xlu0 %v1330_v5  ;;  %1291 = vset.pattern.permute.xlu1 %v1330_v5 }
   0x2   :  { %v1292_v1 = vld [vmem:[%s1626_s1] sm:$0xff]   ;;  %1285 = vmatprep.subr.msk.bf16.mxu0 %vm133_vm0, %v67_v0  ;;  %v135_v2 = vsel %vm133_vm0, %v67_v0, 0  ;;  %322 = vperm.xlu0 %1290, %v248_v4   ;;  %v1294_v7 = vld [vmem:[%s1626_s1 + $0x10] sm:$0xff]   ;;  %v249_v8 = vld [vmem:[%s1628_s3 + $0x78] sm:$0xff] }
   0x3   :  { %1204 = vmatpush3.bf16.msra.mxu0 %v135_v2  ;;  %1205 = vmatprep.mubr.msk.bf16.mxu0 %vm108_vm1, %v1292_v1  ;;  %v246_v6 = vld [vmem:[%s1628_s3 + $0x60] sm:$0xff]  ;;  %v247_v9 = vld [vmem:[%s1628_s3 + $0x68] sm:$0xff]  ;;  %v1295_v10 = vld [vmem:[%s1626_s1 + $0x18] sm:$0xff]  }
   0x4   :  { %312 = vperm.xlu1 %1291, %v246_v6   ;;  %v244_v11 = vld [vmem:[%s1628_s3 + $0x50] sm:$0xff]  ;;  %v245_v12 = vld [vmem:[%s1628_s3 + $0x58] sm:$0xff]  ;;  %v1296_v13 = vld [vmem:[%s1626_s1 + $0x20] sm:$0xff]  }
   0x5   :  { %v242_v14 = vld [vmem:[%s1628_s3 + $0x40] sm:$0xff]  ;;  %v243_v15 = vld [vmem:[%s1628_s3 + $0x48] sm:$0xff]  ;;  %v240_v17 = vld [vmem:[%s1628_s3 + $0x30] sm:$0xff] }
   0x6   :  { %1206 = vmatmul.mubr.msk.bf16.vlgmr.msra.gmra.mxu0 %vm108_vm1, %v1293_v3  ;;  %327 = vperm.xlu0 %1290, %v249_v8   ;;  %v1297_v16 = vld [vmem:[%s1626_s1 + $0x28] sm:$0xff]   ;;  %v241_v18 = vld [vmem:[%s1628_s3 + $0x38] sm:$0xff]  ;;  %v1298_v19 = vld [vmem:[%s1626_s1 + $0x30] sm:$0xff]  }
   0x7   :  { %1209 = vmatprep.mubr.msk.bf16.mxu0 %vm108_vm1, %v1294_v7  ;;  %v238_v20 = vld [vmem:[%s1628_s3 + $0x20] sm:$0xff]  ;;  %v239_v21 = vld [vmem:[%s1628_s3 + $0x28] sm:$0xff]  ;;  %v1299_v22 = vld [vmem:[%s1626_s1 + $0x38] sm:$0xff]  }
   0x8   :  { %317 = vperm.xlu1 %1291, %v247_v9   ;;  %v236_v23 = vld [vmem:[%s1628_s3 + $0x10] sm:$0xff]  ;;  %v237_v24 = vld [vmem:[%s1628_s3 + $0x18] sm:$0xff]  ;;  %v234_v25 = vld [vmem:[%s1628_s3] sm:$0xff] }
   0x9   :  { %v235_v26 = vld [vmem:[%s1628_s3 + $0x8] sm:$0xff] }
   0xa   :  { %302 = vperm.xlu0 %1290, %v244_v11  }
   0xc   :  { %307 = vperm.xlu1 %1291, %v245_v12  }
   0xe   :  { %1210 = vmatmul.mubr.msk.bf16.gmra.mxu0 %vm108_vm1, %v1295_v10  ;;  %292 = vperm.xlu0 %1290, %v242_v14  }
   0xf   :  { %1213 = vmatprep.mubr.msk.bf16.mxu0 %vm108_vm1, %v1296_v13 }
  0x10   :  { %297 = vperm.xlu1 %1291, %v243_v15  }
  0x12   :  { %282 = vperm.xlu0 %1290, %v240_v17  }
  0x14   :  { %287 = vperm.xlu1 %1291, %v241_v18  }
  0x16   :  { %1214 = vmatmul.mubr.msk.bf16.gmra.mxu0 %vm108_vm1, %v1297_v16  ;;  %272 = vperm.xlu0 %1290, %v238_v20  }
  0x17   :  { %1217 = vmatprep.mubr.msk.bf16.mxu0 %vm108_vm1, %v1298_v19 }
  0x18   :  { %277 = vperm.xlu1 %1291, %v239_v21  }
  0x1a   :  { %262 = vperm.xlu0 %1290, %v236_v23  }
  0x1c   :  { %267 = vperm.xlu1 %1291, %v237_v24  }
  0x1e   :  { %1218 = vmatmul.mubr.msk.bf16.gmra.mxu0 %vm108_vm1, %v1299_v22 }
  0x1f   :  { %13 = vsyncpa [#allocation4], 0  ;;  %252 = vperm.xlu0 %1290, %v234_v25   ;;  %v530_v27 = vld [vmem:[%s1629_s4] sm:$0xff]  ;;  %v531_v28 = vld [vmem:[%s1629_s4 + $0x8] sm:$0xff] }
  0x20   :  { %257 = vperm.xlu1 %1291, %v235_v26   ;;  %v532_v29 = vld [vmem:[%s1629_s4 + $0x10] sm:$0xff]  ;;  %v533_v30 = vld [vmem:[%s1629_s4 + $0x18] sm:$0xff]  ;;  %v534_v31 = vld [vmem:[%s1629_s4 + $0x20] sm:$0xff] }
  0x21   :  { %v535_v32 = vld [vmem:[%s1629_s4 + $0x28] sm:$0xff]  ;;  %v536_v33 = vld [vmem:[%s1629_s4 + $0x30] sm:$0xff]  ;;  %v537_v34 = vld [vmem:[%s1629_s4 + $0x38] sm:$0xff] }
  0x22   :  { %v538_v35 = vld [vmem:[%s1629_s4 + $0x40] sm:$0xff]  ;;  %v539_v36 = vld [vmem:[%s1629_s4 + $0x48] sm:$0xff]  ;;  %v540_v37 = vld [vmem:[%s1629_s4 + $0x50] sm:$0xff] }
  0x23   :  { %548 = vperm.xlu0 %1290, %v530_v27   ;;  %v541_v38 = vld [vmem:[%s1629_s4 + $0x58] sm:$0xff]  ;;  %v542_v39 = vld [vmem:[%s1629_s4 + $0x60] sm:$0xff]  ;;  %v543_v40 = vld [vmem:[%s1629_s4 + $0x68] sm:$0xff] }
  0x24   :  { %553 = vperm.xlu1 %1291, %v531_v28   ;;  %v544_v41 = vld [vmem:[%s1629_s4 + $0x70] sm:$0xff]  ;;  %v545_v42 = vld [vmem:[%s1629_s4 + $0x78] sm:$0xff]  ;;  %v850_v43 = vld [vmem:[%s1630_s5] sm:$0xff] }
  0x25   :  { %v851_v44 = vld [vmem:[%s1630_s5 + $0x8] sm:$0xff]  ;;  %v852_v45 = vld [vmem:[%s1630_s5 + $0x10] sm:$0xff]  ;;  %v853_v46 = vld [vmem:[%s1630_s5 + $0x18] sm:$0xff] }
  0x26   :  { %v854_v47 = vld [vmem:[%s1630_s5 + $0x20] sm:$0xff]  ;;  %v855_v48 = vld [vmem:[%s1630_s5 + $0x28] sm:$0xff]  ;;  %v856_v49 = vld [vmem:[%s1630_s5 + $0x30] sm:$0xff] }
  0x27   :  { %558 = vperm.xlu0 %1290, %v532_v29   ;;  %v857_v50 = vld [vmem:[%s1630_s5 + $0x38] sm:$0xff]  ;;  %v858_v51 = vld [vmem:[%s1630_s5 + $0x40] sm:$0xff]  ;;  %v859_v52 = vld [vmem:[%s1630_s5 + $0x48] sm:$0xff] }
  0x28   :  { %563 = vperm.xlu1 %1291, %v533_v30   ;;  %v860_v53 = vld [vmem:[%s1630_s5 + $0x50] sm:$0xff]  ;;  %v861_v54 = vld [vmem:[%s1630_s5 + $0x58] sm:$0xff]  ;;  %v862_v55 = vld [vmem:[%s1630_s5 + $0x60] sm:$0xff] }
  0x29   :  { %v863_v56 = vld [vmem:[%s1630_s5 + $0x68] sm:$0xff]  ;;  %v864_v57 = vld [vmem:[%s1630_s5 + $0x70] sm:$0xff]  ;;  %v865_v58 = vld [vmem:[%s1630_s5 + $0x78] sm:$0xff] }
  0x2a   :  { %v1561_v59 = vld [vmem:[%s1625_s0] sm:$0xff]  ;;  %v1300_v61 = vld [vmem:[%s1632_s7 + $0x38] sm:$0xff]   ;;  %v1301_v62 = vld [vmem:[%s1632_s7 + $0x30] sm:$0xff]  }
  0x2b   :  { %568 = vperm.xlu0 %1290, %v534_v31   ;;  %v358_v60 = vunpack.c.l.s8.bf16 %v1561_v59  ;;  %1253 = vmatprep.subr.bf16.mxu0 %v1300_v61  ;;  %v1302_v63 = vld [vmem:[%s1632_s7 + $0x28] sm:$0xff]   ;;  %v1303_v0 = vld [vmem:[%s1632_s7 + $0x20] sm:$0xff]   ;;  %v1304_v1 = vld [vmem:[%s1632_s7 + $0x18] sm:$0xff]  }
  0x2c   :  { %573 = vperm.xlu1 %1291, %v535_v32   ;;  %1254 = vmatpush3.bf16.msra.mxu0 %v1300_v61 }
  0x2d   :  { %1237 = vmatprep.mubr.bf16.mxu1 %v358_v60  ;;  %1255 = vmatprep.subr.bf16.mxu0 %v1301_v62  ;;  %v359_v60 = vunpack.c.h.s8.bf16 %v1561_v59 }
  0x2f   :  { %578 = vperm.xlu0 %1290, %v536_v33  }
  0x30   :  { %583 = vperm.xlu1 %1291, %v537_v34   ;;  %1256 = vmatpush3.bf16.msra.mxu0 %v1301_v62  ;;  %v356_v62 = vld [vmem:[%s1625_s0 + $0x10] sm:$0xff] }
  0x31   :  { %1257 = vmatprep.subr.bf16.mxu0 %v1302_v63 }
  0x33   :  { %588 = vperm.xlu0 %1290, %v538_v35  }
  0x34   :  { %593 = vperm.xlu1 %1291, %v539_v36   ;;  %1258 = vmatpush3.bf16.msra.mxu0 %v1302_v63 }
  0x35   :  { %1259 = vmatprep.subr.bf16.mxu0 %v1303_v0 }
  0x37   :  { %598 = vperm.xlu0 %1290, %v540_v37  }
  0x38   :  { %603 = vperm.xlu1 %1291, %v541_v38   ;;  %1260 = vmatpush3.bf16.msra.mxu0 %v1303_v0  ;;  %v362_v0 = vunpack.c.l.s8.bf16 %v356_v62 }
  0x39   :  { %1261 = vmatprep.subr.bf16.mxu0 %v1304_v1 }
  0x3b   :  { %608 = vperm.xlu0 %1290, %v542_v39  }
  0x3c   :  { %613 = vperm.xlu1 %1291, %v543_v40   ;;  %1262 = vmatpush3.bf16.msra.mxu0 %v1304_v1  ;;  %v357_v1 = vld [vmem:[%s1625_s0 + $0x18] sm:$0xff] }
  0x3d   :  { %v365_v59 = vunpack.c.h.s8.bf16 %v357_v1 }
  0x3f   :  { %618 = vperm.xlu0 %1290, %v544_v41  }
  0x40   :  { %623 = vperm.xlu1 %1291, %v545_v42  }
  0x43   :  { %868 = vperm.xlu0 %1290, %v850_v43  }
  0x44   :  { %873 = vperm.xlu1 %1291, %v851_v44  }
  0x47   :  { %878 = vperm.xlu0 %1290, %v852_v45  }
  0x48   :  { %883 = vperm.xlu1 %1291, %v853_v46  }
  0x4b   :  { %888 = vperm.xlu0 %1290, %v854_v47  }
  0x4c   :  { %893 = vperm.xlu1 %1291, %v855_v48  }
  0x4f   :  { %898 = vperm.xlu0 %1290, %v856_v49  }
  0x50   :  { %903 = vperm.xlu1 %1291, %v857_v50  }
  0x53   :  { %908 = vperm.xlu0 %1290, %v858_v51  }
  0x54   :  { %913 = vperm.xlu1 %1291, %v859_v52  }
  0x57   :  { %918 = vperm.xlu0 %1290, %v860_v53  }
  0x58   :  { %923 = vperm.xlu1 %1291, %v861_v54  }
  0x5b   :  { %928 = vperm.xlu0 %1290, %v862_v55  }
  0x5c   :  { %933 = vperm.xlu1 %1291, %v863_v56  }
  0x5f   :  { %938 = vperm.xlu0 %1290, %v864_v57  }
  0x60   :  { %943 = vperm.xlu1 %1291, %v865_v58   ;;  %v355_v58 = vld [vmem:[%s1625_s0 + $0x8] sm:$0xff] }
  0x61   :  { %v360_v61 = vunpack.c.l.s8.bf16 %v355_v58  ;;  %v361_v63 = vunpack.c.h.s8.bf16 %v355_v58 }
  0x7d   :  { %v323_v9 = vpop.permute.xlu0 %322 }
  0x7f   :  { %v313_v7 = vpop.permute.xlu1 %312 }
  0x81   :  { %v328_v14 = vpop.permute.xlu0 %327 }
  0x83   :  { %v318_v12 = vpop.permute.xlu1 %317 }
  0x85   :  { %v303_v19 = vpop.permute.xlu0 %302 }
  0x87   :  { %v308_v17 = vpop.permute.xlu1 %307 }
  0x89   :  { %v293_v26 = vpop.permute.xlu0 %292 }
  0x8b   :  { %v298_v22 = vpop.permute.xlu1 %297 }
  0x8d   :  { %v283_v35 = vpop.permute.xlu0 %282 }
  0x8f   :  { %v288_v33 = vpop.permute.xlu1 %287 }
  0x91   :  { %v273_v42 = vpop.permute.xlu0 %272 }
  0x93   :  { %v278_v39 = vpop.permute.xlu1 %277 }
  0x95   :  { %v263_v48 = vpop.permute.xlu0 %262 }
  0x97   :  { %v268_v46 = vpop.permute.xlu1 %267 }
  0x9a   :  { %v253_v55 = vpop.permute.xlu0 %252 }
  0x9b   :  { %v258_v52 = vpop.permute.xlu1 %257 }
  0xc6   :  { %v1207_v2 = vpop.f32.mrf.mxu0 }
  0xc7   :  { %v332_v51 = vmul.f32 %v1207_v2, %v263_v48  ;;  %v363_v2 = vunpack.c.h.s8.bf16 %v356_v62 }
  0xc8   :  { %v1579_v3 = vpop.f32.mrf.mxu0 }
  0xc9   :  { %v330_v56 = vmul.f32 %v253_v55, %v1579_v3  ;;  %v364_v3 = vunpack.c.l.s8.bf16 %v357_v1 }
  0xca   :  { %v1208_v4 = vpop.f32.mrf.mxu0 }
  0xcb   :  { %v333_v49 = vmul.f32 %v1208_v4, %v268_v46  ;;  %v1305_v4 = vld [vmem:[%s1632_s7 + $0x10] sm:$0xff]  }
  0xcc   :  { %v174_v5 = vpop.f32.mrf.mxu0  ;;  %1263 = vmatprep.subr.bf16.mxu0 %v1305_v4 }
  0xcd   :  { %v347_v53 = vpack.c.bf16 %v333_v49, %v332_v51  ;;  %v331_v54 = vmul.f32 %v258_v52, %v174_v5  ;;  %1264 = vmatpush3.bf16.msra.mxu0 %v1305_v4  ;;  %v1306_v5 = vld [vmem:[%s1632_s7 + $0x8] sm:$0xff]  }
  0xce   :  { %v1211_v6 = vpop.f32.mrf.mxu0  ;;  %1265 = vmatprep.subr.bf16.mxu0 %v1306_v5 }
  0xcf   :  { %v336_v43 = vmul.f32 %v1211_v6, %v283_v35  ;;  %v346_v57 = vpack.c.bf16 %v331_v54, %v330_v56  ;;  %v1307_v6 = vld [vmem:[%s1632_s7] sm:$0xff]  }
  0xd0   :  { %v187_v8 = vpop.f32.mrf.mxu0 }
  0xd1   :  { %v334_v47 = vmul.f32 %v273_v42, %v187_v8  ;;  %1266 = vmatpush3.bf16.msra.mxu0 %v1306_v5  ;;  %v554_v8 = vpop.permute.xlu1 %553 }
  0xd2   :  { %v1212_v10 = vpop.f32.mrf.mxu0  ;;  %1267 = vmatprep.subr.bf16.mxu0 %v1307_v6 }
  0xd3   :  { %v337_v40 = vmul.f32 %v1212_v10, %v288_v33 }
  0xd4   :  { %v190_v11 = vpop.f32.mrf.mxu0 }
  0xd5   :  { %v349_v44 = vpack.c.bf16 %v337_v40, %v336_v43  ;;  %v335_v45 = vmul.f32 %v278_v39, %v190_v11  ;;  %1268 = vmatpush3.bf16.msra.mxu0 %v1307_v6  ;;  %v564_v10 = vpop.permute.xlu1 %563 }
  0xd6   :  { %v1215_v13 = vpop.f32.mrf.mxu0 }
  0xd7   :  { %v340_v34 = vmul.f32 %v1215_v13, %v303_v19  ;;  %v348_v50 = vpack.c.bf16 %v335_v45, %v334_v47 }
  0xd8   :  { %v203_v15 = vpop.f32.mrf.mxu0 }
  0xd9   :  { %v338_v38 = vmul.f32 %v293_v26, %v203_v15 }
  0xda   :  { %v1216_v16 = vpop.f32.mrf.mxu0 }
  0xdb   :  { %v341_v31 = vmul.f32 %v1216_v16, %v308_v17 }
  0xdc   :  { %v206_v18 = vpop.f32.mrf.mxu0 }
  0xdd   :  { %v351_v36 = vpack.c.bf16 %v341_v31, %v340_v34  ;;  %v339_v37 = vmul.f32 %v298_v22, %v206_v18 }
  0xde   :  { %v1219_v20 = vpop.f32.mrf.mxu0 }
  0xdf   :  { %v344_v24 = vmul.f32 %v1219_v20, %v323_v9  ;;  %v350_v41 = vpack.c.bf16 %v339_v37, %v338_v38  ;;  %v1604_v20 = vld [vmem:[%s1631_s6] ss:$0 sm:$0xff]  ;;  %s1331_s6 = smov [#allocation3]  }
  0xe0   :  { %v219_v21 = vpop.f32.mrf.mxu0  ;;  %s1047_s7 = sshll.u32 %s1331_s6, 4  ;;  %s1048_s7 = int_to_ptr.vmem [resolvable:$true] %s1047_s7 }
  0xe1   :  { %v342_v28 = vmul.f32 %v313_v7, %v219_v21  ;;  %v549_v7 = vpop.permute.xlu0 %548  ;;  %s1308_s17 = scalar_lea.vmem %s1048_s7, 1024  ;;  %p1313_p1 = scmp.lt.s32.totalorder %s1048_s7, %s1048_s7 }
  0xe2   :  { %v1220_v23 = vpop.f32.mrf.mxu0  ;;  %p1309_p0 = scmp.ne.s32.totalorder %s1048_s7, %s1308_s17  ;;  %p1314_p2 = scmp.lt.s32.totalorder %s1308_s17, %s1308_s17 }
  0xe3   :  { %v345_v25 = vmul.f32 %v1220_v23, %v328_v14 }
  0xe4   :  { %v222_v27 = vpop.f32.mrf.mxu0  ;;  %p1315_p3 = por %p1314_p2, %p1313_p1 }
  0xe5   :  { %v343_v29 = vmul.f32 %v318_v12, %v222_v27  ;;  %v353_v30 = vpack.c.bf16 %v345_v25, %v344_v24  ;;  %v559_v9 = vpop.permute.xlu0 %558  ;;  %v574_v12 = vpop.permute.xlu1 %573 }
  0xe6   :  { %p1316_p4 = pnand %p1315_p3, %p1309_p0 }
  0xe7   :  { %v352_v32 = vpack.c.bf16 %v343_v29, %v342_v28  ;;  %1221 = vmatprep.subr.bf16.mxu1 %v353_v30 }
  0xe8   :  { %1222 = vmatpush3.bf16.msra.mxu1 %v353_v30 }
  0xe9   :  { %1223 = vmatprep.subr.bf16.mxu1 %v352_v32  ;;  %v569_v11 = vpop.permute.xlu0 %568  ;;  %v584_v17 = vpop.permute.xlu1 %583 }
  0xec   :  { %1224 = vmatpush3.bf16.msra.mxu1 %v352_v32 }
  0xed   :  { %1225 = vmatprep.subr.bf16.mxu1 %v351_v36  ;;  %v579_v15 = vpop.permute.xlu0 %578  ;;  %v594_v30 = vpop.permute.xlu1 %593 }
  0xf0   :  { %1226 = vmatpush3.bf16.msra.mxu1 %v351_v36 }
  0xf1   :  { %1227 = vmatprep.subr.bf16.mxu1 %v350_v41  ;;  %v589_v28 = vpop.permute.xlu0 %588  ;;  %v604_v47 = vpop.permute.xlu1 %603 }
  0xf4   :  { %1228 = vmatpush3.bf16.msra.mxu1 %v350_v41 }
  0xf5   :  { %1229 = vmatprep.subr.bf16.mxu1 %v349_v44  ;;  %v599_v43 = vpop.permute.xlu0 %598 }
  0xf8   :  { %1230 = vmatpush3.bf16.msra.mxu1 %v349_v44 }
  0xf9   :  { %1231 = vmatprep.subr.bf16.mxu1 %v348_v50 }
  0xfc   :  { %1232 = vmatpush3.bf16.msra.mxu1 %v348_v50 }
  0xfd   :  { %1233 = vmatprep.subr.bf16.mxu1 %v347_v53 }
 0x100   :  { %1234 = vmatpush3.bf16.msra.mxu1 %v347_v53 }
 0x101   :  { %1235 = vmatprep.subr.bf16.mxu1 %v346_v57 }
 0x104   :  { %1236 = vmatpush3.bf16.msra.mxu1 %v346_v57 }
 0x107   :  { %1238 = vmatmul.mubr.bf16.vlgmr.msra.gmra.mxu1 %v359_v60  ;;  %v609_v60 = vpop.permute.xlu0 %608 }
 0x108   :  { %1241 = vmatprep.mubr.bf16.mxu1 %v360_v61 }
 0x10f   :  { %1242 = vmatmul.mubr.bf16.gmra.mxu1 %v361_v63  ;;  %v614_v63 = vpop.permute.xlu1 %613 }
 0x110   :  { %1245 = vmatprep.mubr.bf16.mxu1 %v362_v0 }
 0x117   :  { %1246 = vmatmul.mubr.bf16.gmra.mxu1 %v363_v2 }
 0x118   :  { %1249 = vmatprep.mubr.bf16.mxu1 %v364_v3 }
 0x11f   :  { %1250 = vmatmul.mubr.bf16.gmra.mxu1 %v365_v59 }
 0x1c7   :  { %v1239_v13 = vpop.f32.mrf.mxu1 }
 0x1c8   :  { %v628_v18 = vmul.f32 %v1239_v13, %v559_v9  ;;  %v619_v9 = vpop.permute.xlu0 %618  ;;  %v624_v13 = vpop.permute.xlu1 %623 }
 0x1c9   :  { %v416_v14 = vpop.f32.mrf.mxu1 }
 0x1ca   :  { %v626_v16 = vmul.f32 %v549_v7, %v416_v14  ;;  %v651_v26 = vadd.f32 %v1604_v20, %v628_v18 }
 0x1cb   :  { %v1240_v19 = vpop.f32.mrf.mxu1 }
 0x1cc   :  { %v629_v21 = vmul.f32 %v1240_v19, %v564_v10  ;;  %v649_v23 = vadd.f32 %v1604_v20, %v626_v16  ;;  %v667_v36 = vmax.f32 %v651_v26, 0.0 }
 0x1cd   :  { %v419_v22 = vpop.f32.mrf.mxu1 }
 0x1ce   :  { %v652_v24 = vadd.f32 %v1604_v20, %v629_v21  ;;  %v627_v25 = vmul.f32 %v554_v8, %v419_v22  ;;  %v665_v33 = vmax.f32 %v649_v23, 0.0 }
 0x1cf   :  { %v1243_v27 = vpop.f32.mrf.mxu1 }
 0x1d0   :  { %v650_v29 = vadd.f32 %v1604_v20, %v627_v25  ;;  %v668_v31 = vmax.f32 %v652_v24, 0.0  ;;  %v632_v37 = vmul.f32 %v1243_v27, %v579_v15 }
 0x1d1   :  { %v432_v32 = vpop.f32.mrf.mxu1 }
 0x1d2   :  { %v666_v34 = vmax.f32 %v650_v29, 0.0  ;;  %v630_v35 = vmul.f32 %v569_v11, %v432_v32  ;;  %v682_v41 = vpack.c.bf16 %v668_v31, %v667_v36  ;;  %v655_v48 = vadd.f32 %v1604_v20, %v632_v37 }
 0x1d3   :  { %v1244_v38 = vpop.f32.mrf.mxu1 }
 0x1d4   :  { %v633_v39 = vmul.f32 %v1244_v38, %v584_v17  ;;  %v681_v40 = vpack.c.bf16 %v666_v34, %v665_v33  ;;  %v653_v44 = vadd.f32 %v1604_v20, %v630_v35  ;;  %v671_v56 = vmax.f32 %v655_v48, 0.0  ;;  %v869_v33 = vpop.permute.xlu0 %868  ;;  %v874_v34 = vpop.permute.xlu1 %873 }
 0x1d5   :  { %v435_v42 = vpop.f32.mrf.mxu1 }
 0x1d6   :  { %v656_v45 = vadd.f32 %v1604_v20, %v633_v39  ;;  %v631_v46 = vmul.f32 %v574_v12, %v435_v42  ;;  %1269 = vmatprep.mubr.bf16.mxu0 %v681_v40  ;;  %v669_v53 = vmax.f32 %v653_v44, 0.0 }
 0x1d7   :  { %v1247_v49 = vpop.f32.mrf.mxu1  ;;  %1270 = vmatmul.mubr.bf16.vlgmr.msra.gmra.mxu0 %v682_v41 }
 0x1d8   :  { %v654_v50 = vadd.f32 %v1604_v20, %v631_v46  ;;  %v672_v51 = vmax.f32 %v656_v45, 0.0  ;;  %v636_v57 = vmul.f32 %v1247_v49, %v599_v43  ;;  %v879_v35 = vpop.permute.xlu0 %878  ;;  %v884_v36 = vpop.permute.xlu1 %883 }
 0x1d9   :  { %v448_v52 = vpop.f32.mrf.mxu1 }
 0x1da   :  { %v670_v54 = vmax.f32 %v654_v50, 0.0  ;;  %v634_v55 = vmul.f32 %v589_v28, %v448_v52  ;;  %v684_v1 = vpack.c.bf16 %v672_v51, %v671_v56  ;;  %v659_v4 = vadd.f32 %v1604_v20, %v636_v57 }
 0x1db   :  { %v1248_v58 = vpop.f32.mrf.mxu1 }
 0x1dc   :  { %v637_v61 = vmul.f32 %v1248_v58, %v604_v47  ;;  %v683_v62 = vpack.c.bf16 %v670_v54, %v669_v53  ;;  %v657_v2 = vadd.f32 %v1604_v20, %v634_v55  ;;  %v675_v14 = vmax.f32 %v659_v4, 0.0  ;;  %v889_v37 = vpop.permute.xlu0 %888  ;;  %v894_v38 = vpop.permute.xlu1 %893 }
 0x1dd   :  { %v451_v0 = vpop.f32.mrf.mxu1 }
 0x1de   :  { %v660_v3 = vadd.f32 %v1604_v20, %v637_v61  ;;  %v635_v59 = vmul.f32 %v594_v30, %v451_v0  ;;  %1273 = vmatprep.mubr.bf16.mxu0 %v683_v62  ;;  %v673_v10 = vmax.f32 %v657_v2, 0.0 }
 0x1df   :  { %v1251_v5 = vpop.f32.mrf.mxu1  ;;  %1274 = vmatmul.mubr.bf16.gmra.mxu0 %v684_v1 }
 0x1e0   :  { %v658_v6 = vadd.f32 %v1604_v20, %v635_v59  ;;  %v676_v7 = vmax.f32 %v660_v3, 0.0  ;;  %v640_v15 = vmul.f32 %v1251_v5, %v619_v9  ;;  %v899_v41 = vpop.permute.xlu0 %898  ;;  %v904_v42 = vpop.permute.xlu1 %903 }
 0x1e1   :  { %v464_v8 = vpop.f32.mrf.mxu1 }
 0x1e2   :  { %v674_v11 = vmax.f32 %v658_v6, 0.0  ;;  %v638_v12 = vmul.f32 %v609_v60, %v464_v8  ;;  %v686_v21 = vpack.c.bf16 %v676_v7, %v675_v14  ;;  %v663_v25 = vadd.f32 %v1604_v20, %v640_v15 }
 0x1e3   :  { %v1252_v16 = vpop.f32.mrf.mxu1 }
 0x1e4   :  { %v641_v17 = vmul.f32 %v1252_v16, %v624_v13  ;;  %v685_v18 = vpack.c.bf16 %v674_v11, %v673_v10  ;;  %v661_v22 = vadd.f32 %v1604_v20, %v638_v12  ;;  %v679_v30 = vmax.f32 %v663_v25, 0.0  ;;  %v909_v50 = vpop.permute.xlu0 %908  ;;  %v914_v52 = vpop.permute.xlu1 %913 }
 0x1e5   :  { %v467_v19 = vpop.f32.mrf.mxu1 }
 0x1e6   :  { %v664_v23 = vadd.f32 %v1604_v20, %v641_v17  ;;  %v639_v24 = vmul.f32 %v614_v63, %v467_v19  ;;  %1277 = vmatprep.mubr.bf16.mxu0 %v685_v18  ;;  %v677_v28 = vmax.f32 %v661_v22, 0.0 }
 0x1e7   :  { %1278 = vmatmul.mubr.bf16.gmra.mxu0 %v686_v21 }
 0x1e8   :  { %v662_v26 = vadd.f32 %v1604_v20, %v639_v24  ;;  %v680_v27 = vmax.f32 %v664_v23, 0.0  ;;  %v919_v58 = vpop.permute.xlu0 %918  ;;  %v924_v63 = vpop.permute.xlu1 %923 }
 0x1ea   :  { %v678_v29 = vmax.f32 %v662_v26, 0.0  ;;  %v688_v32 = vpack.c.bf16 %v680_v27, %v679_v30 }
 0x1ec   :  { %v687_v31 = vpack.c.bf16 %v678_v29, %v677_v28  ;;  %v929_v59 = vpop.permute.xlu0 %928  ;;  %v934_v6 = vpop.permute.xlu1 %933 }
 0x1ee   :  { %1281 = vmatprep.mubr.bf16.mxu0 %v687_v31 }
 0x1ef   :  { %1282 = vmatmul.mubr.bf16.gmra.mxu0 %v688_v32 }
 0x1f0   :  { %v939_v14 = vpop.permute.xlu0 %938  ;;  %v944_v15 = vpop.permute.xlu1 %943 }
 0x297   :  { %v1271_v39 = vpop.f32.mrf.mxu0 }
 0x298   :  { %v948_v20 = vmul.f32 %v1271_v39, %v879_v35 }
 0x299   :  { %v787_v40 = vpop.f32.mrf.mxu0 }
 0x29a   :  { %v946_v46 = vmul.f32 %v869_v33, %v787_v40 }
 0x29b   :  { %v1272_v43 = vpop.f32.mrf.mxu0 }
 0x29c   :  { %v949_v44 = vmul.f32 %v1272_v43, %v884_v36 }
 0x29d   :  { %v790_v45 = vpop.f32.mrf.mxu0 }
 0x29e   :  { %v1123_v47 = vpack.c.bf16 %v949_v44, %v948_v20  ;;  %v947_v48 = vmul.f32 %v874_v34, %v790_v45 }
 0x29f   :  { %v1275_v49 = vpop.f32.mrf.mxu0 }
 0x2a0   :  { %1155 = vst [vmem:[#allocation3 + $0x8] sm:$0xff] %v1123_v47   ;;  %v1118_v51 = vpack.c.bf16 %v947_v48, %v946_v46  ;;  %v952_v55 = vmul.f32 %v1275_v49, %v899_v41 }
 0x2a1   :  { %v803_v53 = vpop.f32.mrf.mxu0 }
 0x2a2   :  { %1119 = vst [vmem:[#allocation3] sm:$0xff] %v1118_v51   ;;  %v950_v60 = vmul.f32 %v889_v37, %v803_v53 }
 0x2a3   :  { %v1276_v54 = vpop.f32.mrf.mxu0 }
 0x2a4   :  { %v953_v56 = vmul.f32 %v1276_v54, %v904_v42 }
 0x2a5   :  { %v806_v57 = vpop.f32.mrf.mxu0 }
 0x2a6   :  { %v1133_v61 = vpack.c.bf16 %v953_v56, %v952_v55  ;;  %v951_v62 = vmul.f32 %v894_v38, %v806_v57 }
 0x2a7   :  { %v1279_v0 = vpop.f32.mrf.mxu0 }
 0x2a8   :  { %1157 = vst [vmem:[#allocation3 + $0x18] sm:$0xff] %v1133_v61   ;;  %v1128_v1 = vpack.c.bf16 %v951_v62, %v950_v60  ;;  %v956_v4 = vmul.f32 %v1279_v0, %v919_v58 }
 0x2a9   :  { %v819_v2 = vpop.f32.mrf.mxu0 }
 0x2aa   :  { %1156 = vst [vmem:[#allocation3 + $0x10] sm:$0xff] %v1128_v1   ;;  %v954_v8 = vmul.f32 %v909_v50, %v819_v2 }
 0x2ab   :  { %v1280_v3 = vpop.f32.mrf.mxu0 }
 0x2ac   :  { %v957_v5 = vmul.f32 %v1280_v3, %v924_v63 }
 0x2ad   :  { %v822_v7 = vpop.f32.mrf.mxu0 }
 0x2ae   :  { %v1143_v9 = vpack.c.bf16 %v957_v5, %v956_v4  ;;  %v955_v10 = vmul.f32 %v914_v52, %v822_v7 }
 0x2af   :  { %v1283_v11 = vpop.f32.mrf.mxu0 }
 0x2b0   :  { %1159 = vst [vmem:[#allocation3 + $0x28] sm:$0xff] %v1143_v9   ;;  %v1138_v12 = vpack.c.bf16 %v955_v10, %v954_v8  ;;  %v960_v17 = vmul.f32 %v1283_v11, %v939_v14 }
 0x2b1   :  { %v835_v13 = vpop.f32.mrf.mxu0 }
 0x2b2   :  { %1158 = vst [vmem:[#allocation3 + $0x20] sm:$0xff] %v1138_v12   ;;  %v958_v21 = vmul.f32 %v929_v59, %v835_v13 }
 0x2b3   :  { %v1284_v16 = vpop.f32.mrf.mxu0 }
 0x2b4   :  { %v961_v18 = vmul.f32 %v1284_v16, %v944_v15 }
 0x2b5   :  { %v838_v19 = vpop.f32.mrf.mxu0 }
 0x2b6   :  { %v1153_v22 = vpack.c.bf16 %v961_v18, %v960_v17  ;;  %v959_v23 = vmul.f32 %v934_v6, %v838_v19 }
 0x2b8   :  { %1161 = vst [vmem:[#allocation3 + $0x38] sm:$0xff] %v1153_v22   ;;  %v1148_v24 = vpack.c.bf16 %v959_v23, %v958_v21 }
 0x2ba   :  { %1160 = vst [vmem:[#allocation3 + $0x30] sm:$0xff] %v1148_v24  }
 0x2bb   :  { %1319 = shalt.err (!%p1316_p4)
}
 0x2bc   :  { %s1332_s18 = smov 64   ;;  %s1333_s19 = smov 4  }
 0x2bd   :  { %1053 = dma.vmem_to_hbm [thread:$0]  %s1048_s7, 1024, %s1633_s8, [#allocation4], %s1332_s18, %s1332_s18, %s1333_s19  }
 0x2be   :  { %1328 = dma.done.wait [#allocation4], 1024  }
 0x2bf   :  { %1329 = vsyncadd [#allocation4], 4294966272 }
 0x2c0   :  { %1057 = vsyncpa [#allocation4], 1 }

</bundles_post_ra>
